<compile_context>
chip_gen: v7x
topology: tpu7x:2x2x1
jax: 0.10.0
libtpu: 0.0.40
codegen_flags: <defaults>
</compile_context>

<pallas_src>
import jax
import jax.numpy as jnp
from jax.experimental import pallas as pl
from jax.experimental.pallas import tpu as pltpu

# Small, shape-consistent configuration.
B, S, H, C, V, FF = 2, 8, 32, 4, 64, 64          # S must be a power of two (pos one-hot)

CP = 128          # lane-padded class/loss output width (lane-dense store)
SEG = 128         # lane-tile segment width inside the packed weight slab

# ---- packed H-input weight slab: lane-tile-aligned segments (H=32 cols each, zero pad) ----
COL_Q, COL_K, COL_V = 0 * SEG, 1 * SEG, 2 * SEG   # qkv slices land on 128-lane boundaries
COL_WO, COL_W1, COL_WC = 3 * SEG, 4 * SEG, 5 * SEG
W_COLS = 6 * SEG

# ---- packed [tok_emb ; pos_emb ; w2] slab (all have H columns) ----
ROW_TOK = 0
ROW_POS = V                 # pos rows right after the vocabulary rows
ROW_W2 = 80                 # 16-aligned start (bf16 sublane tile) for w2 rows
R_BIG = ROW_W2 + FF         # 144 rows total

# ---- packed bias / layernorm slab, one row each, width 3*SEG ----
ROW_BQKV, ROW_BO, ROW_B1, ROW_B2 = 0, 1, 2, 3
ROW_LN1G, ROW_LN1B, ROW_LN2G, ROW_LN2B = 4, 5, 6, 7
ROW_BC = 8
N_VEC = 9
VEC_COLS = 3 * SEG

LBL = 127                   # lane of the (B,128) mask/label slab that carries the label


# ----------------------------------------------------------------------------
# Single fused kernel: embed + encoder layer + CLS pooling + classifier + CE
# ----------------------------------------------------------------------------
def fused_forward_kernel(ids_ref, ml_ref, big_ref, w_slab_ref, vec_ref, out_ref):
    f32, bf16 = jnp.float32, jnp.bfloat16

    # ---- token + position embedding as ONE one-hot MXU matmul (no XLA gather kernel) ----
    ids = ids_ref[...]                                                   # (B*S, 1) int32
    lane = jax.lax.broadcasted_iota(jnp.int32, (B * S, R_BIG), 1)
    row = jax.lax.broadcasted_iota(jnp.int32, (B * S, R_BIG), 0)
    pos_lane = ROW_POS + (row & (S - 1))                                 # pos of row r = r mod S
    hit = (lane == ids) | (lane == pos_lane)                             # token rows < V, pos rows >= V
    onehot = jnp.where(hit, 1.0, 0.0).astype(bf16)                       # (B*S, R_BIG)
    x2 = jnp.dot(onehot, big_ref[...], preferred_element_type=f32)       # (B*S, H) = tok_emb[id]+pos_emb
    x2b = x2.astype(bf16)

    # ---- fused lane-aligned QKV projection (1/sqrt(H) folded into the q columns) ----
    qkv = jnp.dot(x2b, w_slab_ref[:, 0:3 * SEG], preferred_element_type=f32)
    qkv = qkv + vec_ref[ROW_BQKV:ROW_BQKV + 1, :]                        # (B*S, 3*SEG)
    q = qkv[:, COL_Q:COL_Q + H].reshape(B, S, H)
    k = qkv[:, COL_K:COL_K + H].reshape(B, S, H)
    v = qkv[:, COL_V:COL_V + H].reshape(B, S, H)

    # ---- single-head attention over the whole batch ----
    scores = jnp.einsum('bqd,bkd->bqk', q.astype(bf16), k.astype(bf16),
                        preferred_element_type=f32)                      # (B, S, S)
    mask_bias = ml_ref[:, 0:S]                                           # (B, S): 0 keep, -1e30 pad
    scores = scores + mask_bias[:, None, :]                              # mask padded keys
    # NOTE: padded *query* rows are not masked; harmless since only CLS (row 0) is pooled.
    m = jnp.max(scores, axis=-1, keepdims=True)
    e = jnp.exp(scores - m)
    denom = jnp.sum(e, axis=-1, keepdims=True)
    p = e * pl.reciprocal(denom, approx=True)                            # EUP instead of VALU divide
    ctx = jnp.einsum('bqk,bkd->bqd', p.astype(bf16), v.astype(bf16),
                     preferred_element_type=f32)                         # (B, S, H)

    attn_out = (jnp.dot(ctx.reshape(B * S, H).astype(bf16),
                        w_slab_ref[:, COL_WO:COL_WO + H],
                        preferred_element_type=f32)
                + vec_ref[ROW_BO:ROW_BO + 1, 0:H])

    # ---- residual + layernorm 1 (f32 elementwise) ----
    h = x2 + attn_out
    mu = jnp.mean(h, axis=-1, keepdims=True)
    var = jnp.mean((h - mu) ** 2, axis=-1, keepdims=True)
    h = ((h - mu) * jax.lax.rsqrt(var + 1e-5)
         * vec_ref[ROW_LN1G:ROW_LN1G + 1, 0:H] + vec_ref[ROW_LN1B:ROW_LN1B + 1, 0:H])

    # ---- feed-forward with tanh-GELU (approximation; exact erf-GELU differs slightly) ----
    f = (jnp.dot(h.astype(bf16), w_slab_ref[:, COL_W1:COL_W1 + FF],
                 preferred_element_type=f32) + vec_ref[ROW_B1:ROW_B1 + 1, 0:FF])
    f = 0.5 * f * (1.0 + jnp.tanh(0.7978845608028654 * (f + 0.044715 * f * f * f)))
    f = (jnp.dot(f.astype(bf16), big_ref[ROW_W2:ROW_W2 + FF, :],
                 preferred_element_type=f32) + vec_ref[ROW_B2:ROW_B2 + 1, 0:H])

    # ---- residual + layernorm 2 ----
    h2 = h + f
    mu2 = jnp.mean(h2, axis=-1, keepdims=True)
    var2 = jnp.mean((h2 - mu2) ** 2, axis=-1, keepdims=True)
    hidden = ((h2 - mu2) * jax.lax.rsqrt(var2 + 1e-5)
              * vec_ref[ROW_LN2G:ROW_LN2G + 1, 0:H] + vec_ref[ROW_LN2B:ROW_LN2B + 1, 0:H])

    # ---- classifier on all rows; CLS selection deferred to after the MXU pass ----
    logits_all = (jnp.dot(hidden.astype(bf16), w_slab_ref[:, COL_WC:COL_WC + CP],
                          preferred_element_type=f32)
                  + vec_ref[ROW_BC:ROW_BC + 1, 0:CP])                    # (B*S, CP)
    logits_pad = logits_all.reshape(B, S, CP)[:, 0, :]                   # (B, CP) CLS rows

    # ---- stable per-example cross-entropy over the C valid class columns ----
    col = jax.lax.broadcasted_iota(jnp.int32, (B, CP), 1)
    valid = col < C
    masked_logits = jnp.where(valid, logits_pad, -1e30)
    lm = jnp.max(masked_logits, axis=-1, keepdims=True)
    lse = lm + jnp.log(jnp.sum(jnp.exp(masked_logits - lm), axis=-1, keepdims=True))
    logp = masked_logits - lse
    label = ml_ref[:, LBL:LBL + 1].astype(jnp.int32)                     # (B, 1)
    per_ex_loss = -jnp.sum(jnp.where(col == label, logp, 0.0), axis=-1, keepdims=True)

    # ---- single lane-dense store: cols [0,C) logits, col CP-1 per-example CE ----
    out_ref[...] = (jnp.where(valid, logits_pad, 0.0)
                    + jnp.where(col == CP - 1, per_ex_loss, 0.0))


# ----------------------------------------------------------------------------
# Parameter packing: done ONCE at init (hoisted out of the per-call path).
# ----------------------------------------------------------------------------
def pack_params(params):
    scale = 1.0 / (H ** 0.5)

    w_slab = jnp.zeros((H, W_COLS), jnp.float32)
    w_slab = w_slab.at[:, COL_Q:COL_Q + H].set(params["wq"] * scale)
    w_slab = w_slab.at[:, COL_K:COL_K + H].set(params["wk"])
    w_slab = w_slab.at[:, COL_V:COL_V + H].set(params["wv"])
    w_slab = w_slab.at[:, COL_WO:COL_WO + H].set(params["wo"])
    w_slab = w_slab.at[:, COL_W1:COL_W1 + FF].set(params["w1"])
    w_slab = w_slab.at[:, COL_WC:COL_WC + C].set(params["wc"])
    w_slab = w_slab.astype(jnp.bfloat16)                   # MXU-native, half the DMA bytes

    big = jnp.zeros((R_BIG, H), jnp.float32)                # [tok_emb ; pos_emb ; pad ; w2]
    big = big.at[ROW_TOK:ROW_TOK + V, :].set(params["tok_emb"])
    big = big.at[ROW_POS:ROW_POS + S, :].set(params["pos_emb"])
    big = big.at[ROW_W2:ROW_W2 + FF, :].set(params["w2"])
    big = big.astype(jnp.bfloat16)

    vec = jnp.zeros((N_VEC, VEC_COLS), jnp.float32)
    vec = vec.at[ROW_BQKV, COL_Q:COL_Q + H].set(params["bq"][0] * scale)
    vec = vec.at[ROW_BQKV, COL_K:COL_K + H].set(params["bk"][0])
    vec = vec.at[ROW_BQKV, COL_V:COL_V + H].set(params["bv"][0])
    vec = vec.at[ROW_BO, 0:H].set(params["bo"][0])
    vec = vec.at[ROW_B1, 0:FF].set(params["b1"][0])
    vec = vec.at[ROW_B2, 0:H].set(params["b2"][0])
    vec = vec.at[ROW_LN1G, 0:H].set(params["ln1_g"][0])
    vec = vec.at[ROW_LN1B, 0:H].set(params["ln1_b"][0])
    vec = vec.at[ROW_LN2G, 0:H].set(params["ln2_g"][0])
    vec = vec.at[ROW_LN2B, 0:H].set(params["ln2_b"][0])
    vec = vec.at[ROW_BC, 0:C].set(params["bc"][0])
    return (big, w_slab, vec)


# ----------------------------------------------------------------------------
# Jitted forward wrapper (tiny per-call prep, one pallas_call, output slicing)
# ----------------------------------------------------------------------------
@jax.jit
def review_classifier_forward(packed, input_ids, attention_mask, labels=None):
    big, w_slab, vec = packed

    ids = input_ids.reshape(B * S, 1).astype(jnp.int32)
    ml = jnp.zeros((B, CP), jnp.float32)
    ml = ml.at[:, 0:S].set(jnp.where(attention_mask > 0, 0.0, -1e30).astype(jnp.float32))
    if labels is not None:
        ml = ml.at[:, LBL].set(labels.astype(jnp.float32))

    out = pl.pallas_call(
        fused_forward_kernel,
        out_shape=jax.ShapeDtypeStruct((B, CP), jnp.float32),
        grid=(1,),                                   # whole batch, one invocation
        in_specs=[pl.BlockSpec((B * S, 1), lambda i: (0, 0)),
                  pl.BlockSpec((B, CP), lambda i: (0, 0)),
                  pl.BlockSpec((R_BIG, H), lambda i: (0, 0)),
                  pl.BlockSpec((H, W_COLS), lambda i: (0, 0)),
                  pl.BlockSpec((N_VEC, VEC_COLS), lambda i: (0, 0))],
        out_specs=pl.BlockSpec((B, CP), lambda i: (0, 0)),
        compiler_params=pltpu.CompilerParams(
            dimension_semantics=("arbitrary",)),
    )(ids, ml, big, w_slab, vec)

    logits = out[:, :C]
    if labels is not None:
        loss = jnp.mean(out[:, CP - 1])              # CrossEntropyLoss reduction='mean'
        return loss, logits
    return logits


def init_params(key):
    ks = jax.random.split(key, 10)

    def dense(k, shape, scale=0.02):
        return (scale * jax.random.normal(k, shape)).astype(jnp.float32)

    zeros = lambda shape: jnp.zeros(shape, jnp.float32)
    ones = lambda shape: jnp.ones(shape, jnp.float32)
    return dict(
        tok_emb=dense(ks[0], (V, H)),
        pos_emb=dense(ks[1], (S, H)),
        wq=dense(ks[2], (H, H)), bq=zeros((1, H)),
        wk=dense(ks[3], (H, H)), bk=zeros((1, H)),
        wv=dense(ks[4], (H, H)), bv=zeros((1, H)),
        wo=dense(ks[5], (H, H)), bo=zeros((1, H)),
        ln1_g=ones((1, H)), ln1_b=zeros((1, H)),
        w1=dense(ks[6], (H, FF)), b1=zeros((1, FF)),
        w2=dense(ks[7], (FF, H)), b2=zeros((1, H)),
        ln2_g=ones((1, H)), ln2_b=zeros((1, H)),
        wc=dense(ks[8], (H, C)), bc=zeros((1, C)),
    )


if __name__ == "__main__":
    key = jax.random.PRNGKey(0)
    pkey, ikey = jax.random.split(key)
    params = init_params(pkey)
    packed = pack_params(params)                     # packed once, reused every call

    input_ids = jax.random.randint(ikey, (B, S), 0, V, dtype=jnp.int32)
    attention_mask = jnp.ones((B, S), dtype=jnp.int32).at[:, S - 2:].set(0)
    labels = jnp.array([1, 3], dtype=jnp.int32)

    # with labels -> (loss, logits); without -> logits
    loss, logits = review_classifier_forward(packed, input_ids, attention_mask, labels)
    logits_only = review_classifier_forward(packed, input_ids, attention_mask, None)
    jax.block_until_ready((loss, logits, logits_only))
    print("KERNEL_OK")
</pallas_src>

<mosaic_0001>
module attributes {stable_mosaic.version = 11 : i64} {
  func.func @fused_forward_kernel(%arg0: i32, %arg1: memref<16x1xi32, #tpu.memory_space<vmem>>, %arg2: memref<2x128xf32, #tpu.memory_space<vmem>>, %arg3: memref<144x32xbf16, #tpu.memory_space<vmem>>, %arg4: memref<32x768xbf16, #tpu.memory_space<vmem>>, %arg5: memref<9x384xf32, #tpu.memory_space<vmem>>, %arg6: memref<2x128xf32, #tpu.memory_space<vmem>>) attributes {dimension_semantics = [#tpu.dimension_semantics<arbitrary>], iteration_bounds = array<i64: 1>, scalar_prefetch = 0 : i64, scratch_operands = 0 : i64, tpu.core_type = #tpu.core_type<tc>, window_params = [{pipeline_mode = #tpu.pipeline_mode<synchronous>, transform_indices = @transform_0, window_bounds = array<i64: 16, 1>}, {pipeline_mode = #tpu.pipeline_mode<synchronous>, transform_indices = @transform_1, window_bounds = array<i64: 2, 128>}, {pipeline_mode = #tpu.pipeline_mode<synchronous>, transform_indices = @transform_2, window_bounds = array<i64: 144, 32>}, {pipeline_mode = #tpu.pipeline_mode<synchronous>, transform_indices = @transform_3, window_bounds = array<i64: 32, 768>}, {pipeline_mode = #tpu.pipeline_mode<synchronous>, transform_indices = @transform_4, window_bounds = array<i64: 9, 384>}, {pipeline_mode = #tpu.pipeline_mode<synchronous>, transform_indices = @transform_5, window_bounds = array<i64: 2, 128>}]} {
    %c0 = arith.constant 0 : index
    %c0_0 = arith.constant 0 : index
    %0 = vector.load %arg1[%c0, %c0_0] : memref<16x1xi32, #tpu.memory_space<vmem>>, vector<16x1xi32>
    %1 = tpu.iota {dimensions = array<i32: 1>} : vector<16x144xi32>
    %2 = tpu.iota {dimensions = array<i32: 0>} : vector<16x144xi32>
    %c7_i32 = arith.constant 7 : i32
    %3 = vector.broadcast %c7_i32 : i32 to vector<16x144xi32>
    %4 = arith.andi %2, %3 : vector<16x144xi32>
    %c64_i32 = arith.constant 64 : i32
    %5 = vector.broadcast %c64_i32 : i32 to vector<16x144xi32>
    %6 = arith.addi %5, %4 : vector<16x144xi32>
    %7 = vector.broadcast %0 : vector<16x1xi32> to vector<16x144xi32>
    %8 = arith.cmpi eq, %1, %7 : vector<16x144xi32>
    %9 = arith.cmpi eq, %1, %6 : vector<16x144xi32>
    %10 = arith.ori %8, %9 : vector<16x144xi1>
    %cst = arith.constant 1.000000e+00 : f32
    %cst_1 = arith.constant 0.000000e+00 : f32
    %11 = vector.broadcast %cst : f32 to vector<16x144xf32>
    %12 = vector.broadcast %cst_1 : f32 to vector<16x144xf32>
    %13 = arith.select %10, %11, %12 : vector<16x144xi1>, vector<16x144xf32>
    %14 = arith.truncf %13 : vector<16x144xf32> to vector<16x144xbf16>
    %c0_2 = arith.constant 0 : index
    %c0_3 = arith.constant 0 : index
    %15 = vector.load %arg3[%c0_2, %c0_3] : memref<144x32xbf16, #tpu.memory_space<vmem>>, vector<144x32xbf16>
    %cst_4 = arith.constant dense<0.000000e+00> : vector<16x32xf32>
    %16 = tpu.matmul %14, %15, %cst_4 {dimension_numbers = #tpu.dot_dimension_numbers<[1], [0], [0], [1], [0, 0, 1, 1], [], []>} : vector<16x144xbf16>, vector<144x32xbf16>, vector<16x32xf32> -> vector<16x32xf32>
    %17 = arith.truncf %16 : vector<16x32xf32> to vector<16x32xbf16>
    %c0_5 = arith.constant 0 : index
    %c0_6 = arith.constant 0 : index
    %18 = vector.load %arg4[%c0_5, %c0_6] : memref<32x768xbf16, #tpu.memory_space<vmem>>, vector<32x384xbf16>
    %cst_7 = arith.constant dense<0.000000e+00> : vector<16x384xf32>
    %19 = tpu.matmul %17, %18, %cst_7 {dimension_numbers = #tpu.dot_dimension_numbers<[1], [0], [0], [1], [0, 0, 1, 1], [], []>} : vector<16x32xbf16>, vector<32x384xbf16>, vector<16x384xf32> -> vector<16x384xf32>
    %c0_8 = arith.constant 0 : index
    %c0_9 = arith.constant 0 : index
    %20 = vector.load %arg5[%c0_8, %c0_9] : memref<9x384xf32, #tpu.memory_space<vmem>>, vector<1x384xf32>
    %21 = vector.broadcast %20 : vector<1x384xf32> to vector<16x384xf32>
    %22 = arith.addf %19, %21 : vector<16x384xf32>
    %23 = vector.extract_strided_slice %22 {offsets = [0, 0], sizes = [16, 32], strides = [1, 1]} : vector<16x384xf32> to vector<16x32xf32>
    %24 = vector.shape_cast %23 : vector<16x32xf32> to vector<2x8x32xf32>
    %25 = vector.extract_strided_slice %22 {offsets = [0, 128], sizes = [16, 32], strides = [1, 1]} : vector<16x384xf32> to vector<16x32xf32>
    %26 = vector.shape_cast %25 : vector<16x32xf32> to vector<2x8x32xf32>
    %27 = vector.extract_strided_slice %22 {offsets = [0, 256], sizes = [16, 32], strides = [1, 1]} : vector<16x384xf32> to vector<16x32xf32>
    %28 = vector.shape_cast %27 : vector<16x32xf32> to vector<2x8x32xf32>
    %29 = arith.truncf %24 : vector<2x8x32xf32> to vector<2x8x32xbf16>
    %30 = arith.truncf %26 : vector<2x8x32xf32> to vector<2x8x32xbf16>
    "tpu.trace_start"() <{level = 10 : i32, message = "bqd,bkd->bqk"}> : () -> ()
    %cst_10 = arith.constant dense<0.000000e+00> : vector<2x8x8xf32>
    %31 = tpu.matmul %29, %30, %cst_10 {dimension_numbers = #tpu.dot_dimension_numbers<[2], [2], [1], [1], [0, 0, 0, 1, 1, 1], [0], [0]>} : vector<2x8x32xbf16>, vector<2x8x32xbf16>, vector<2x8x8xf32> -> vector<2x8x8xf32>
    "tpu.trace_stop"() : () -> ()
    %c0_11 = arith.constant 0 : index
    %c0_12 = arith.constant 0 : index
    %32 = vector.load %arg2[%c0_11, %c0_12] : memref<2x128xf32, #tpu.memory_space<vmem>>, vector<2x8xf32>
    %33 = vector.shape_cast %32 : vector<2x8xf32> to vector<2x1x8xf32>
    %34 = vector.broadcast %33 : vector<2x1x8xf32> to vector<2x8x8xf32>
    %35 = arith.addf %31, %34 : vector<2x8x8xf32>
    %cst_13 = arith.constant dense<0xFF800000> : vector<2x8xf32>
    %36 = vector.multi_reduction <maximumf>, %35, %cst_13 [2] : vector<2x8x8xf32> to vector<2x8xf32>
    %37 = vector.shape_cast %36 : vector<2x8xf32> to vector<2x8x1xf32>
    %38 = vector.broadcast %37 : vector<2x8x1xf32> to vector<2x8x8xf32>
    %39 = arith.subf %35, %38 : vector<2x8x8xf32>
    %40 = math.exp %39 : vector<2x8x8xf32>
    %cst_14 = arith.constant dense<0.000000e+00> : vector<2x8xf32>
    %41 = vector.multi_reduction <add>, %40, %cst_14 [2] : vector<2x8x8xf32> to vector<2x8xf32>
    %42 = vector.shape_cast %41 : vector<2x8xf32> to vector<2x8x1xf32>
    %43 = tpu.reciprocal %42 {approx = true} : vector<2x8x1xf32> -> vector<2x8x1xf32>
    %44 = vector.broadcast %43 : vector<2x8x1xf32> to vector<2x8x8xf32>
    %45 = arith.mulf %40, %44 : vector<2x8x8xf32>
    %46 = arith.truncf %45 : vector<2x8x8xf32> to vector<2x8x8xbf16>
    %47 = arith.truncf %28 : vector<2x8x32xf32> to vector<2x8x32xbf16>
    "tpu.trace_start"() <{level = 10 : i32, message = "bqk,bkd->bqd"}> : () -> ()
    %cst_15 = arith.constant dense<0.000000e+00> : vector<2x8x32xf32>
    %48 = tpu.matmul %46, %47, %cst_15 {dimension_numbers = #tpu.dot_dimension_numbers<[2], [1], [1], [2], [0, 0, 0, 1, 1, 2], [0], [0]>} : vector<2x8x8xbf16>, vector<2x8x32xbf16>, vector<2x8x32xf32> -> vector<2x8x32xf32>
    "tpu.trace_stop"() : () -> ()
    %49 = vector.shape_cast %48 : vector<2x8x32xf32> to vector<16x32xf32>
    %50 = arith.truncf %49 : vector<16x32xf32> to vector<16x32xbf16>
    %c0_16 = arith.constant 0 : index
    %c384 = arith.constant 384 : index
    %51 = vector.load %arg4[%c0_16, %c384] : memref<32x768xbf16, #tpu.memory_space<vmem>>, vector<32x32xbf16>
    %cst_17 = arith.constant dense<0.000000e+00> : vector<16x32xf32>
    %52 = tpu.matmul %50, %51, %cst_17 {dimension_numbers = #tpu.dot_dimension_numbers<[1], [0], [0], [1], [0, 0, 1, 1], [], []>} : vector<16x32xbf16>, vector<32x32xbf16>, vector<16x32xf32> -> vector<16x32xf32>
    %c1 = arith.constant 1 : index
    %c0_18 = arith.constant 0 : index
    %53 = vector.load %arg5[%c1, %c0_18] : memref<9x384xf32, #tpu.memory_space<vmem>>, vector<1x32xf32>
    %54 = vector.broadcast %53 : vector<1x32xf32> to vector<16x32xf32>
    %55 = arith.addf %52, %54 : vector<16x32xf32>
    %56 = arith.addf %16, %55 : vector<16x32xf32>
    %cst_19 = arith.constant dense<0.000000e+00> : vector<16xf32>
    %57 = vector.multi_reduction <add>, %56, %cst_19 [1] : vector<16x32xf32> to vector<16xf32>
    %58 = vector.shape_cast %57 : vector<16xf32> to vector<16x1xf32>
    %cst_20 = arith.constant 3.200000e+01 : f32
    %59 = vector.broadcast %cst_20 : f32 to vector<16x1xf32>
    %60 = arith.divf %58, %59 : vector<16x1xf32>
    %61 = vector.broadcast %60 : vector<16x1xf32> to vector<16x32xf32>
    %62 = arith.subf %56, %61 : vector<16x32xf32>
    %63 = arith.mulf %62, %62 : vector<16x32xf32>
    %cst_21 = arith.constant dense<0.000000e+00> : vector<16xf32>
    %64 = vector.multi_reduction <add>, %63, %cst_21 [1] : vector<16x32xf32> to vector<16xf32>
    %65 = vector.shape_cast %64 : vector<16xf32> to vector<16x1xf32>
    %cst_22 = arith.constant 3.200000e+01 : f32
    %66 = vector.broadcast %cst_22 : f32 to vector<16x1xf32>
    %67 = arith.divf %65, %66 : vector<16x1xf32>
    %68 = vector.broadcast %60 : vector<16x1xf32> to vector<16x32xf32>
    %69 = arith.subf %56, %68 : vector<16x32xf32>
    %cst_23 = arith.constant 9.99999974E-6 : f32
    %70 = vector.broadcast %cst_23 : f32 to vector<16x1xf32>
    %71 = arith.addf %67, %70 : vector<16x1xf32>
    %72 = math.rsqrt %71 : vector<16x1xf32>
    %73 = vector.broadcast %72 : vector<16x1xf32> to vector<16x32xf32>
    %74 = arith.mulf %69, %73 : vector<16x32xf32>
    %c4 = arith.constant 4 : index
    %c0_24 = arith.constant 0 : index
    %75 = vector.load %arg5[%c4, %c0_24] : memref<9x384xf32, #tpu.memory_space<vmem>>, vector<1x32xf32>
    %76 = vector.broadcast %75 : vector<1x32xf32> to vector<16x32xf32>
    %77 = arith.mulf %74, %76 : vector<16x32xf32>
    %c5 = arith.constant 5 : index
    %c0_25 = arith.constant 0 : index
    %78 = vector.load %arg5[%c5, %c0_25] : memref<9x384xf32, #tpu.memory_space<vmem>>, vector<1x32xf32>
    %79 = vector.broadcast %78 : vector<1x32xf32> to vector<16x32xf32>
    %80 = arith.addf %77, %79 : vector<16x32xf32>
    %81 = arith.truncf %80 : vector<16x32xf32> to vector<16x32xbf16>
    %c0_26 = arith.constant 0 : index
    %c512 = arith.constant 512 : index
    %82 = vector.load %arg4[%c0_26, %c512] : memref<32x768xbf16, #tpu.memory_space<vmem>>, vector<32x64xbf16>
    %cst_27 = arith.constant dense<0.000000e+00> : vector<16x64xf32>
    %83 = tpu.matmul %81, %82, %cst_27 {dimension_numbers = #tpu.dot_dimension_numbers<[1], [0], [0], [1], [0, 0, 1, 1], [], []>} : vector<16x32xbf16>, vector<32x64xbf16>, vector<16x64xf32> -> vector<16x64xf32>
    %c2 = arith.constant 2 : index
    %c0_28 = arith.constant 0 : index
    %84 = vector.load %arg5[%c2, %c0_28] : memref<9x384xf32, #tpu.memory_space<vmem>>, vector<1x64xf32>
    %85 = vector.broadcast %84 : vector<1x64xf32> to vector<16x64xf32>
    %86 = arith.addf %83, %85 : vector<16x64xf32>
    %cst_29 = arith.constant 5.000000e-01 : f32
    %87 = vector.broadcast %cst_29 : f32 to vector<16x64xf32>
    %88 = arith.mulf %87, %86 : vector<16x64xf32>
    %cst_30 = arith.constant 4.471500e-02 : f32
    %89 = vector.broadcast %cst_30 : f32 to vector<16x64xf32>
    %90 = arith.mulf %89, %86 : vector<16x64xf32>
    %91 = arith.mulf %90, %86 : vector<16x64xf32>
    %92 = arith.mulf %91, %86 : vector<16x64xf32>
    %93 = arith.addf %86, %92 : vector<16x64xf32>
    %cst_31 = arith.constant 0.797884583 : f32
    %94 = vector.broadcast %cst_31 : f32 to vector<16x64xf32>
    %95 = arith.mulf %94, %93 : vector<16x64xf32>
    %96 = math.tanh %95 : vector<16x64xf32>
    %cst_32 = arith.constant 1.000000e+00 : f32
    %97 = vector.broadcast %cst_32 : f32 to vector<16x64xf32>
    %98 = arith.addf %97, %96 : vector<16x64xf32>
    %99 = arith.mulf %88, %98 : vector<16x64xf32>
    %100 = arith.truncf %99 : vector<16x64xf32> to vector<16x64xbf16>
    %c80 = arith.constant 80 : index
    %c0_33 = arith.constant 0 : index
    %101 = vector.load %arg3[%c80, %c0_33] : memref<144x32xbf16, #tpu.memory_space<vmem>>, vector<64x32xbf16>
    %cst_34 = arith.constant dense<0.000000e+00> : vector<16x32xf32>
    %102 = tpu.matmul %100, %101, %cst_34 {dimension_numbers = #tpu.dot_dimension_numbers<[1], [0], [0], [1], [0, 0, 1, 1], [], []>} : vector<16x64xbf16>, vector<64x32xbf16>, vector<16x32xf32> -> vector<16x32xf32>
    %c3 = arith.constant 3 : index
    %c0_35 = arith.constant 0 : index
    %103 = vector.load %arg5[%c3, %c0_35] : memref<9x384xf32, #tpu.memory_space<vmem>>, vector<1x32xf32>
    %104 = vector.broadcast %103 : vector<1x32xf32> to vector<16x32xf32>
    %105 = arith.addf %102, %104 : vector<16x32xf32>
    %106 = arith.addf %80, %105 : vector<16x32xf32>
    %cst_36 = arith.constant dense<0.000000e+00> : vector<16xf32>
    %107 = vector.multi_reduction <add>, %106, %cst_36 [1] : vector<16x32xf32> to vector<16xf32>
    %108 = vector.shape_cast %107 : vector<16xf32> to vector<16x1xf32>
    %cst_37 = arith.constant 3.200000e+01 : f32
    %109 = vector.broadcast %cst_37 : f32 to vector<16x1xf32>
    %110 = arith.divf %108, %109 : vector<16x1xf32>
    %111 = vector.broadcast %110 : vector<16x1xf32> to vector<16x32xf32>
    %112 = arith.subf %106, %111 : vector<16x32xf32>
    %113 = arith.mulf %112, %112 : vector<16x32xf32>
    %cst_38 = arith.constant dense<0.000000e+00> : vector<16xf32>
    %114 = vector.multi_reduction <add>, %113, %cst_38 [1] : vector<16x32xf32> to vector<16xf32>
    %115 = vector.shape_cast %114 : vector<16xf32> to vector<16x1xf32>
    %cst_39 = arith.constant 3.200000e+01 : f32
    %116 = vector.broadcast %cst_39 : f32 to vector<16x1xf32>
    %117 = arith.divf %115, %116 : vector<16x1xf32>
    %118 = vector.broadcast %110 : vector<16x1xf32> to vector<16x32xf32>
    %119 = arith.subf %106, %118 : vector<16x32xf32>
    %cst_40 = arith.constant 9.99999974E-6 : f32
    %120 = vector.broadcast %cst_40 : f32 to vector<16x1xf32>
    %121 = arith.addf %117, %120 : vector<16x1xf32>
    %122 = math.rsqrt %121 : vector<16x1xf32>
    %123 = vector.broadcast %122 : vector<16x1xf32> to vector<16x32xf32>
    %124 = arith.mulf %119, %123 : vector<16x32xf32>
    %c6 = arith.constant 6 : index
    %c0_41 = arith.constant 0 : index
    %125 = vector.load %arg5[%c6, %c0_41] : memref<9x384xf32, #tpu.memory_space<vmem>>, vector<1x32xf32>
    %126 = vector.broadcast %125 : vector<1x32xf32> to vector<16x32xf32>
    %127 = arith.mulf %124, %126 : vector<16x32xf32>
    %c7 = arith.constant 7 : index
    %c0_42 = arith.constant 0 : index
    %128 = vector.load %arg5[%c7, %c0_42] : memref<9x384xf32, #tpu.memory_space<vmem>>, vector<1x32xf32>
    %129 = vector.broadcast %128 : vector<1x32xf32> to vector<16x32xf32>
    %130 = arith.addf %127, %129 : vector<16x32xf32>
    %131 = arith.truncf %130 : vector<16x32xf32> to vector<16x32xbf16>
    %c0_43 = arith.constant 0 : index
    %c640 = arith.constant 640 : index
    %132 = vector.load %arg4[%c0_43, %c640] : memref<32x768xbf16, #tpu.memory_space<vmem>>, vector<32x128xbf16>
    %cst_44 = arith.constant dense<0.000000e+00> : vector<16x128xf32>
    %133 = tpu.matmul %131, %132, %cst_44 {dimension_numbers = #tpu.dot_dimension_numbers<[1], [0], [0], [1], [0, 0, 1, 1], [], []>} : vector<16x32xbf16>, vector<32x128xbf16>, vector<16x128xf32> -> vector<16x128xf32>
    %c8 = arith.constant 8 : index
    %c0_45 = arith.constant 0 : index
    %134 = vector.load %arg5[%c8, %c0_45] : memref<9x384xf32, #tpu.memory_space<vmem>>, vector<1x128xf32>
    %135 = vector.broadcast %134 : vector<1x128xf32> to vector<16x128xf32>
    %136 = arith.addf %133, %135 : vector<16x128xf32>
    %137 = vector.shape_cast %136 : vector<16x128xf32> to vector<2x8x128xf32>
    %138 = vector.extract_strided_slice %137 {offsets = [0, 0, 0], sizes = [2, 1, 128], strides = [1, 1, 1]} : vector<2x8x128xf32> to vector<2x1x128xf32>
    %139 = vector.shape_cast %138 : vector<2x1x128xf32> to vector<2x128xf32>
    %140 = tpu.iota {dimensions = array<i32: 1>} : vector<2x128xi32>
    %c4_i32 = arith.constant 4 : i32
    %141 = vector.broadcast %c4_i32 : i32 to vector<2x128xi32>
    %142 = arith.cmpi slt, %140, %141 : vector<2x128xi32>
    %cst_46 = arith.constant -1.000000e+30 : f32
    %143 = vector.broadcast %cst_46 : f32 to vector<2x128xf32>
    %144 = arith.select %142, %139, %143 : vector<2x128xi1>, vector<2x128xf32>
    %cst_47 = arith.constant dense<0xFF800000> : vector<2xf32>
    %145 = vector.multi_reduction <maximumf>, %144, %cst_47 [1] : vector<2x128xf32> to vector<2xf32>
    %146 = vector.shape_cast %145 : vector<2xf32> to vector<2x1xf32>
    %147 = vector.broadcast %146 : vector<2x1xf32> to vector<2x128xf32>
    %148 = arith.subf %144, %147 : vector<2x128xf32>
    %149 = math.exp %148 : vector<2x128xf32>
    %cst_48 = arith.constant dense<0.000000e+00> : vector<2xf32>
    %150 = vector.multi_reduction <add>, %149, %cst_48 [1] : vector<2x128xf32> to vector<2xf32>
    %151 = vector.shape_cast %150 : vector<2xf32> to vector<2x1xf32>
    %152 = math.log %151 : vector<2x1xf32>
    %153 = arith.addf %146, %152 : vector<2x1xf32>
    %154 = vector.broadcast %153 : vector<2x1xf32> to vector<2x128xf32>
    %155 = arith.subf %144, %154 : vector<2x128xf32>
    %c0_49 = arith.constant 0 : index
    %c127 = arith.constant 127 : index
    %156 = vector.load %arg2[%c0_49, %c127] : memref<2x128xf32, #tpu.memory_space<vmem>>, vector<2x1xf32>
    %157 = arith.fptosi %156 : vector<2x1xf32> to vector<2x1xi32>
    %158 = vector.broadcast %157 : vector<2x1xi32> to vector<2x128xi32>
    %159 = arith.cmpi eq, %140, %158 : vector<2x128xi32>
    %cst_50 = arith.constant 0.000000e+00 : f32
    %160 = vector.broadcast %cst_50 : f32 to vector<2x128xf32>
    %161 = arith.select %159, %155, %160 : vector<2x128xi1>, vector<2x128xf32>
    %cst_51 = arith.constant dense<0.000000e+00> : vector<2xf32>
    %162 = vector.multi_reduction <add>, %161, %cst_51 [1] : vector<2x128xf32> to vector<2xf32>
    %163 = vector.shape_cast %162 : vector<2xf32> to vector<2x1xf32>
    %cst_52 = arith.constant 0.000000e+00 : f32
    %164 = vector.broadcast %cst_52 : f32 to vector<2x1xf32>
    %165 = arith.subf %164, %163 : vector<2x1xf32>
    %cst_53 = arith.constant 0.000000e+00 : f32
    %166 = vector.broadcast %cst_53 : f32 to vector<2x128xf32>
    %167 = arith.select %142, %139, %166 : vector<2x128xi1>, vector<2x128xf32>
    %c127_i32 = arith.constant 127 : i32
    %168 = vector.broadcast %c127_i32 : i32 to vector<2x128xi32>
    %169 = arith.cmpi eq, %140, %168 : vector<2x128xi32>
    %cst_54 = arith.constant 0.000000e+00 : f32
    %170 = vector.shape_cast %165 : vector<2x1xf32> to vector<2x1xf32>
    %171 = vector.broadcast %170 : vector<2x1xf32> to vector<2x128xf32>
    %172 = vector.broadcast %cst_54 : f32 to vector<2x128xf32>
    %173 = arith.select %169, %171, %172 : vector<2x128xi1>, vector<2x128xf32>
    %174 = arith.addf %167, %173 : vector<2x128xf32>
    %c0_55 = arith.constant 0 : index
    %c0_56 = arith.constant 0 : index
    %175 = vector.load %arg6[%c0_55, %c0_56] : memref<2x128xf32, #tpu.memory_space<vmem>>, vector<2x128xf32>
    tpu.vector_store %arg6[%c0_55, %c0_56], %174 {strides = array<i32>} : memref<2x128xf32, #tpu.memory_space<vmem>>, vector<2x128xf32>,
    return
  }
  func.func @transform_0(%arg0: i32) -> (i32, i32) {
    %c0_i32 = arith.constant 0 : i32
    %c0_i32_0 = arith.constant 0 : i32
    %c0_i32_1 = arith.constant 0 : i32
    return %c0_i32, %c0_i32_0 : i32, i32
  }
  func.func @transform_1(%arg0: i32) -> (i32, i32) {
    %c0_i32 = arith.constant 0 : i32
    %c0_i32_0 = arith.constant 0 : i32
    %c0_i32_1 = arith.constant 0 : i32
    return %c0_i32, %c0_i32_0 : i32, i32
  }
  func.func @transform_2(%arg0: i32) -> (i32, i32) {
    %c0_i32 = arith.constant 0 : i32
    %c0_i32_0 = arith.constant 0 : i32
    %c0_i32_1 = arith.constant 0 : i32
    return %c0_i32, %c0_i32_0 : i32, i32
  }
  func.func @transform_3(%arg0: i32) -> (i32, i32) {
    %c0_i32 = arith.constant 0 : i32
    %c0_i32_0 = arith.constant 0 : i32
    %c0_i32_1 = arith.constant 0 : i32
    return %c0_i32, %c0_i32_0 : i32, i32
  }
  func.func @transform_4(%arg0: i32) -> (i32, i32) {
    %c0_i32 = arith.constant 0 : i32
    %c0_i32_0 = arith.constant 0 : i32
    %c0_i32_1 = arith.constant 0 : i32
    return %c0_i32, %c0_i32_0 : i32, i32
  }
  func.func @transform_5(%arg0: i32) -> (i32, i32) {
    %c0_i32 = arith.constant 0 : i32
    %c0_i32_0 = arith.constant 0 : i32
    %c0_i32_1 = arith.constant 0 : i32
    return %c0_i32, %c0_i32_0 : i32, i32
  }
}

</mosaic_0001>

<bundles_post_ra>
// kernel: review_classifier_forward.1
= control target key start
LH: loop header
LB: loop body
LE: loop exit
PB: predicated region body
PF: predicated region fallthrough
CT: control target
= control target key end

     0   :  { %v1158_v0 = vmov 0   ;;  %v1159_v14 = vmov 0.0   ;;  %v23_v15 = vlaneseq  ;;  %vm129_vm7 = vcmask 130048   ;;  %s1399_s0 = inlined_call_operand.vmem [shape: s32[16,1], index: 0, kind: input, shape index: {}]   ;;  %s1400_s2 = inlined_call_operand.vmem [shape: bf16[144,32], index: 2, kind: input, shape index: {}]   ;;  %s1401_s3 = inlined_call_operand.vmem [shape: bf16[32,768], index: 3, kind: input, shape index: {}]   ;;  %s1402_s4 = inlined_call_operand.vmem [shape: f32[9,384], index: 4, kind: input, shape index: {}]   ;;  %s1403_s1 = inlined_call_operand.vmem [shape: f32[2,128], index: 1, kind: input, shape index: {}]   ;;  %s1404_s5 = inlined_call_operand.vmem [shape: f32[2,128], index: 5, kind: output, shape index: {}]  }
   0x1   :  { %1104 = vset.pattern.permute.xlu0 %v1158_v0  ;;  %v21_v1 = vld [vmem:[%s1399_s0] sm:$0xff]  ;;  %133 = vmatprep.subr.bf16.mxu0 %v1158_v0  ;;  %v22_v3 = vld [vmem:[%s1399_s0 + $0x8] sm:$0xff]  ;;  %v1109_v5 = vld [vmem:[%s1400_s2 + $0x10] sm:$0xff]   ;;  %v1160_v29 = vmov 1.0|1.0   ;;  %vm1161_vm10 = vmmov 0  }
   0x2   :  { %34 = vperm.xlu0 %1104, %v21_v1   ;;  %v1107_v2 = vld [vmem:[%s1400_s2] sm:$0xff]   ;;  %268 = vmatprep.mubr.bf16.mxu1 %v1158_v0  ;;  %v1108_v4 = vld [vmem:[%s1400_s2 + $0x8] sm:$0xff]   ;;  %v1110_v6 = vld [vmem:[%s1400_s2 + $0x18] sm:$0xff]   ;;  %v1234_v16 = vshrl.u32 %v23_v15, 7  ;;  %v1237_v18 = vand.u32 127, %v23_v15  ;;  %vm232_vm11 = vcmask 261120  }
   0x3   :  { %134 = vmatpush1.bf16.msra.mxu0 %v1107_v2  ;;  %v1116_v7 = vld [vmem:[%s1401_s3 + $0x4] ss:$24 sps:$4 sm:$0xff]   ;;  %v1118_v8 = vld [vmem:[%s1401_s3] ss:$24 sps:$4 sm:$0xff]   ;;  %v1112_v10 = vld [vmem:[%s1400_s2 + $0x28] sm:$0xff]   ;;  %vm480_vm12 = vcmask 1043456  }
   0x4   :  { %135 = vmatprep.subr.bf16.mxu0 %v1158_v0  ;;  %v1111_v9 = vld [vmem:[%s1400_s2 + $0x20] sm:$0xff]   ;;  %236 = vmatprep.subr.bf16.mxu1 %v1116_v7  ;;  %v1113_v11 = vld [vmem:[%s1400_s2 + $0x30] sm:$0xff]   ;;  %v1114_v12 = vld [vmem:[%s1400_s2 + $0x38] sm:$0xff]   ;;  %v28_v17 = vadd.s32 8, %v1234_v16  ;;  %v29_v20 = vand.u32 7, %v1234_v16  ;;  %v25_v21 = vadd.s32 128, %v1237_v18 }
   0x5   :  { %237 = vmatpush1.bf16.msra.mxu1 %v1118_v8  ;;  %v1115_v13 = vld [vmem:[%s1400_s2 + $0x40] sm:$0xff]   ;;  %v1119_v30 = vld [vmem:[%s1401_s3 + $0x34] ss:$24 sps:$4 sm:$0xff]   ;;  %v1121_v31 = vld [vmem:[%s1401_s3 + $0x30] ss:$24 sps:$4 sm:$0xff]   ;;  %v191_v39 = vsub.s32 1, %v1234_v16 }
   0x6   :  { %37 = vperm.xlu0 %1104, %v22_v3   ;;  %v30_v19 = vand.u32 7, %v28_v17  ;;  %v31_v24 = vadd.s32 64, %v29_v20  ;;  %238 = vmatprep.subr.bf16.mxu1 %v1119_v30  ;;  %v1122_v35 = vld [vmem:[%s1401_s3 + $0x8] ss:$24 sps:$4 sm:$0xff]   ;;  %v1123_v38 = vld [vmem:[%s1401_s3 + $0x38] ss:$24 sps:$4 sm:$0xff]  }
   0x7   :  { %136 = vmatpush1.bf16.msra.mxu0 %v1108_v4  ;;  %v183_v40 = vld [vmem:[%s1402_s4] ss:$8 sm:$0x7]  ;;  %v187_v42 = vsub.s32 0, %v1234_v16  ;;  %v195_v50 = vsub.s32 2, %v1234_v16  ;;  %vm450_vm13 = vcmask 64512  }
   0x8   :  { %137 = vmatprep.subr.bf16.mxu0 %v1158_v0  ;;  %v32_v22 = vadd.s32 64, %v30_v19  ;;  %vm43_vm2 = vcmp.eq.s32.totalorder %v1237_v18, %v31_v24  ;;  %v192_v41 = vrot.slane %v183_v40, %v191_v39  ;;  %vm781_vm14 = vcmask 523264  }
   0x9   :  { %239 = vmatpush1.bf16.msra.mxu1 %v1121_v31  ;;  %v188_v48 = vrot.slane %v183_v40, %v187_v42  ;;  %v196_v55 = vrot.slane %v183_v40, %v195_v50  ;;  %v1124_v50 = vld [vmem:[%s1401_s3 + $0xc] ss:$24 sps:$4 sm:$0xff]   ;;  %vm926_vm15 = vcmask 1041409  }
   0xa   :  { %vm45_vm1 = vcmp.eq.s32.totalorder %v1237_v18, %v32_v22  ;;  %1028 = vmatprep.subr.bf16.mxu1 %v1159_v14 }
   0xb   :  { %138 = vmatpush1.bf16.msra.mxu0 %v1109_v5 }
   0xc   :  { %139 = vmatprep.subr.bf16.mxu0 %v1158_v0 }
   0xf   :  { %140 = vmatpush1.bf16.msra.mxu0 %v1110_v6  ;;  %v1162_v6 = vmov 1966171168  }
  0x10   :  { %141 = vmatprep.subr.bf16.mxu0 %v1158_v0  ;;  %v335_v7 = vunpack.c.l.s4 %v1162_v6 }
  0x12   :  { %v336_v8 = vunpack.c.0.s8 %v335_v7 }
  0x13   :  { %142 = vmatpush1.bf16.msra.mxu0 %v1111_v9 }
  0x14   :  { %143 = vmatprep.subr.bf16.mxu0 %v1158_v0  ;;  %v339_v9 = vsub.s32 %v336_v8, %v1234_v16 }
  0x17   :  { %144 = vmatpush1.bf16.msra.mxu0 %v1112_v10  ;;  %v984_v10 = vld.sshfl [vmem:[%s1403_s1] sm:$0x11 pattern:$0x75316420] }
  0x18   :  { %145 = vmatprep.subr.bf16.mxu0 %v1158_v0 }
  0x1b   :  { %146 = vmatpush1.bf16.msra.mxu0 %v1113_v11  ;;  %v340_v11 = vrot.slane %v984_v10, %v339_v9 }
  0x1c   :  { %147 = vmatprep.subr.bf16.mxu0 %v1158_v0 }
  0x1f   :  { %148 = vmatpush1.bf16.msra.mxu0 %v1114_v12  ;;  %v351_v12 = vrot.slane %v340_v11, %v187_v42 }
  0x20   :  { %149 = vmatprep.subr.bf16.mxu0 %v1158_v0 }
  0x23   :  { %150 = vmatpush1.bf16.msra.mxu0 %v1115_v13  ;;  %v333_v13 = vcombine.high %v984_v10, %v984_v10 }
  0x24   :  { %1054 = vmatprep.subr.bf16.mxu0 %v1159_v14 }
  0x25   :  { %v347_v20 = vrot.slane %v333_v13, %v339_v9 }
  0x27   :  { %v355_v24 = vrot.slane %v347_v20, %v187_v42  ;;  %v1127_v20 = vld [vmem:[%s1401_s3 + $0x40] ss:$24 sps:$4 sm:$0xff]  }
  0x81   :  { %v35_v23 = vpop.permute.xlu0 %34 }
  0x82   :  { %vm40_vm0 = vcmp.eq.s32.totalorder %v25_v21, %v35_v23  ;;  %vm39_vm3 = vcmp.eq.s32.totalorder %v1237_v18, %v35_v23 }
  0x83   :  { %v52_v26 = vsel %vm40_vm0, 1.0, %v1159_v14  ;;  %vm47_vm8 = vmor %vm39_vm3, %vm43_vm2  ;;  %vm922_vm0 = vcmp.lt.s32.totalorder %v1237_v18, 4  ;;  %vm956_vm3 = vcmp.eq.s32.totalorder %v1237_v18, 127 }
  0x85   :  { %v38_v25 = vpop.permute.xlu0 %37 }
  0x86   :  { %vm41_vm4 = vcmp.eq.s32.totalorder %v1237_v18, %v38_v25  ;;  %vm42_vm5 = vcmp.eq.s32.totalorder %v25_v21, %v38_v25 }
  0x87   :  { %vm49_vm6 = vmor %vm41_vm4, %vm45_vm1  ;;  %v54_v27 = vsel %vm42_vm5, 1.0, %v1159_v14  ;;  %vm930_vm1 = vcmask 1041408  }
  0x88   :  { %v56_v28 = vpack.c.bf16 %v54_v27, %v52_v26  ;;  %vm974_vm9 = vmpackc.low %vm49_vm6, %vm47_vm8 }
  0x8a   :  { %973 = vmatprep.mubr.msk.bf16.mxu0 %vm129_vm7, %v56_v28 }
  0x8b   :  { %975 = vmatmul.mubr.msk.bf16.vlgmr.msra.gmra.mrb[0].mxu0 %vm974_vm9, %v1160_v29 }
  0x8c   :  { %1056 = vmatprep.mubr.msk.bf16.mxu0 %vm1161_vm10, %v1159_v14 }
 0x15e   :  { %v1256_v32 = vpop.f32.mrb[0].mxu0 }
 0x15f   :  { %v169_v33 = vpop.f32.mrb[1].mxu0 }
 0x160   :  { %v1258_v34 = vpop.f32.mrb[2].mxu0 }
 0x161   :  { %v174_v36 = vpack.c.bf16 %v1258_v34, %v1256_v32  ;;  %v172_v37 = vpop.f32.mrb[3].mxu0 }
 0x163   :  { %982 = vmatmul.mubr.msk.bf16.vlgmr.msra.gmra.mrb[0].mxu1 %vm232_vm11, %v174_v36 }
 0x164   :  { %1029 = vmatpush3.bf16.msra.mxu1 %v1122_v35  ;;  %1032 = vmatprep.mubr.msk.bf16.mxu1 %vm1161_vm10, %v1159_v14 }
 0x165   :  { %1030 = vmatprep.subr.bf16.mxu1 %v1159_v14 }
 0x168   :  { %1031 = vmatpush3.bf16.msra.mxu1 %v1123_v38 }
 0x169   :  { %1036 = vmatprep.subr.bf16.mxu1 %v1159_v14 }
 0x16b   :  { %1033 = vmatmul.mubr.msk.bf16.vlgmr.msra.gmra.mrb[4].mxu1 %vm232_vm11, %v174_v36 }
 0x16c   :  { %1038 = vmatprep.mubr.msk.bf16.mxu1 %vm1161_vm10, %v1159_v14 }
 0x236   :  { %v270_v43 = vpop.f32.mrb[0].mxu1 }
 0x237   :  { %v272_v44 = vpop.f32.mrb[1].mxu1  ;;  %v271_v53 = vadd.f32 %v270_v43, %v188_v48 }
 0x238   :  { %v273_v45 = vadd.f32 %v272_v44, %v192_v41  ;;  %v274_v46 = vpop.f32.mrb[2].mxu1 }
 0x239   :  { %v276_v47 = vpop.f32.mrb[3].mxu1  ;;  %v320_v61 = vpack.c.bf16 %v271_v53, %v271_v53  ;;  %v275_v2 = vadd.f32 %v274_v46, %v188_v48 }
 0x23a   :  { %v322_v49 = vpack.c.bf16 %v273_v45, %v273_v45  ;;  %v277_v52 = vadd.f32 %v276_v47, %v192_v41 }
 0x23b   :  { %v321_v4 = vpack.c.bf16 %v275_v2, %v275_v2 }
 0x23c   :  { %v362_v51 = vsel %vm232_vm11, %v322_v49, 0  ;;  %v323_v57 = vpack.c.bf16 %v277_v52, %v277_v52 }
 0x23d   :  { %1037 = vmatpush3.bf16.xpose.msra.mxu1 %v362_v51  ;;  %v1125_v51 = vld [vmem:[%s1401_s3 + $0x3c] ss:$24 sps:$4 sm:$0xff]  }
 0x23e   :  { %v313_v54 = vpop.f32.mrb[4].mxu1  ;;  %1042 = vmatprep.subr.bf16.mxu1 %v1159_v14  ;;  %v408_v63 = vsel %vm232_vm11, %v323_v57, 0 }
 0x23f   :  { %v1034_v56 = vpop.f32.mrb[5].mxu1  ;;  %v314_v0 = vadd.f32 %v313_v54, %v196_v55 }
 0x240   :  { %v316_v58 = vpop.f32.mrb[6].mxu1 }
 0x241   :  { %v317_v59 = vadd.f32 %v316_v58, %v196_v55  ;;  %v1035_v60 = vpop.f32.mrb[7].mxu1  ;;  %v475_v3 = vpack.c.bf16 %v314_v0, %v314_v0 }
 0x243   :  { %v476_v62 = vpack.c.bf16 %v317_v59, %v317_v59  ;;  %v482_v5 = vsel %vm480_vm12, %v475_v3, 0 }
 0x244   :  { %1039 = vmatmul.mubr.msk.bf16.vlgmr.msra.gmra.mrb[8].mxu1 %vm232_vm11, %v320_v61  ;;  %v575_v61 = vld [vmem:[%s1402_s4 + $0x1] ss:$0 sm:$0xff] }
 0x245   :  { %v528_v1 = vsel %vm480_vm12, %v476_v62, 0  ;;  %1043 = vmatpush3.bf16.xpose.msra.mxu1 %v408_v63  ;;  %1044 = vmatprep.mubr.msk.bf16.mxu1 %vm1161_vm10, %v1159_v14 }
 0x246   :  { %1055 = vmatpush3.bf16.msra.mxu0 %v528_v1  ;;  %1048 = vmatprep.subr.bf16.mxu1 %v1159_v14 }
 0x247   :  { %1068 = vmatprep.subr.bf16.mxu0 %v1159_v14 }
 0x24c   :  { %1045 = vmatmul.mubr.msk.bf16.vlgmr.msra.gmra.mrb[12].mxu1 %vm232_vm11, %v321_v4 }
 0x24d   :  { %1049 = vmatpush3.bf16.msra.mxu1 %v482_v5  ;;  %1050 = vmatprep.mubr.msk.bf16.mxu1 %vm1161_vm10, %v1159_v14 }
 0x24e   :  { %1060 = vmatprep.subr.bf16.mxu1 %v1159_v14 }
 0x317   :  { %v398_v15 = vpop.f32.mrb[8].mxu1 }
 0x318   :  { %v399_v17 = vadd.f32 %v398_v15, %v351_v12  ;;  %v1040_v19 = vpop.f32.mrb[9].mxu1 }
 0x319   :  { %v401_v21 = vpop.f32.mrb[10].mxu1 }
 0x31a   :  { %v1041_v22 = vpop.f32.mrb[11].mxu1  ;;  %v451_v23 = vsel %vm450_vm13, %v399_v17, -inf }
 0x31b   :  { %452 = vmax.xlane.f32.xlu1 %v451_v23 }
 0x31f   :  { %v444_v25 = vpop.f32.mrb[12].mxu1 }
 0x320   :  { %v445_v16 = vadd.f32 %v444_v25, %v355_v24  ;;  %v1046_v26 = vpop.f32.mrb[13].mxu1 }
 0x321   :  { %v447_v27 = vpop.f32.mrb[14].mxu1 }
 0x322   :  { %v1047_v28 = vpop.f32.mrb[15].mxu1  ;;  %v454_v29 = vsel %vm450_vm13, %v445_v16, -inf }
 0x323   :  { %455 = vmax.xlane.f32.xlu1 %v454_v29  ;;  %v661_v28 = vld [vmem:[%s1402_s4 + $0x4] ss:$0 sm:$0xff] }
 0x3a8   :  { %v453_v30 = vpop.xlane.xlu1 %452 }
 0x3a9   :  { %v457_v31 = vsub.f32 %v399_v17, %v453_v30 }
 0x3ab   :  { %v459_v33 = vmul.f32 1.442695, %v457_v31 }
 0x3ad   :  { %1134 = vpow2.f32 %v459_v33  ;;  %v664_v33 = vld [vmem:[%s1402_s4 + $0x5] ss:$0 sm:$0xff] }
 0x3b0   :  { %v456_v35 = vpop.xlane.xlu1 %455 }
 0x3b1   :  { %v458_v36 = vsub.f32 %v445_v16, %v456_v35 }
 0x3b3   :  { %v461_v37 = vmul.f32 1.442695, %v458_v36 }
 0x3b5   :  { %1136 = vpow2.f32 %v461_v37 }
 0x3b7   :  { %v1135_v38 = vpop.eup %1134 }
 0x3b8   :  { %v463_v39 = vsel %vm450_vm13, %v1135_v38, 0.0 }
 0x3b9   :  { %464 = vadd.xlane.f32.xlu0 %v463_v39  ;;  %v1128_v39 = vld [vmem:[%s1400_s2 + $0x28] sm:$0xff]  }
 0x3bf   :  { %v1137_v40 = vpop.eup %1136 }
 0x3c0   :  { %v466_v41 = vsel %vm450_vm13, %v1137_v40, 0.0 }
 0x3c1   :  { %467 = vadd.xlane.f32.xlu1 %v466_v41  ;;  %v1130_v41 = vld [vmem:[%s1400_s2 + $0x38] sm:$0xff]  }
 0x446   :  { %v465_v42 = vpop.xlane.xlu0 %464 }
 0x447   :  { %1138 = vrcp.f32 %v465_v42  ;;  %v1131_v42 = vld [vmem:[%s1400_s2 + $0x40] sm:$0xff]  }
 0x44e   :  { %v468_v43 = vpop.xlane.xlu1 %467 }
 0x44f   :  { %1140 = vrcp.f32 %v468_v43  ;;  %v672_v43 = vld [vmem:[%s1402_s4 + $0x2] ss:$0 sm:$0xff] }
 0x451   :  { %v1139_v44 = vpop.eup %1138 }
 0x452   :  { %v471_v45 = vmul.f32 %v1139_v44, %v1135_v38 }
 0x454   :  { %v473_v46 = vpack.c.bf16 %v471_v45, %v471_v45 }
 0x456   :  { %1051 = vmatmul.mubr.msk.bf16.vlgmr.msra.gmra.mrb[16].mxu1 %vm450_vm13, %v473_v46 }
 0x457   :  { %1064 = vmatprep.mubr.msk.bf16.mxu1 %vm1161_vm10, %v1159_v14  ;;  %1061 = vmatpush3.bf16.msra.mxu1 %v1124_v50 }
 0x458   :  { %1062 = vmatprep.subr.bf16.mxu1 %v1159_v14 }
 0x459   :  { %v1141_v47 = vpop.eup %1140 }
 0x45a   :  { %v472_v48 = vmul.f32 %v1141_v47, %v1137_v40  ;;  %v1129_v40 = vld [vmem:[%s1400_s2 + $0x30] sm:$0xff]  }
 0x45b   :  { %1063 = vmatpush3.bf16.msra.mxu1 %v1125_v51 }
 0x45c   :  { %v474_v49 = vpack.c.bf16 %v472_v48, %v472_v48  ;;  %1076 = vmatprep.subr.bf16.mxu1 %v1159_v14 }
 0x45e   :  { %1057 = vmatmul.mubr.msk.bf16.vlgmr.msra.gmra.mrb[4].mxu0 %vm450_vm13, %v474_v49 }
 0x45f   :  { %1072 = vmatprep.mubr.msk.bf16.mxu0 %vm1161_vm10, %v1159_v14 }
 0x529   :  { %v518_v52 = vpop.f32.mrb[16].mxu1 }
 0x52a   :  { %v1052_v53 = vpop.f32.mrb[17].mxu1 }
 0x52b   :  { %v521_v54 = vpop.f32.mrb[18].mxu1 }
 0x52c   :  { %v1053_v55 = vpop.f32.mrb[19].mxu1 }
 0x531   :  { %v564_v56 = vpop.f32.mrb[4].mxu0 }
 0x532   :  { %v570_v57 = vpack.c.bf16 %v564_v56, %v518_v52  ;;  %v1058_v58 = vpop.f32.mrb[5].mxu0 }
 0x533   :  { %v567_v59 = vpop.f32.mrb[6].mxu0 }
 0x534   :  { %v1059_v60 = vpop.f32.mrb[7].mxu0  ;;  %1065 = vmatmul.mubr.msk.bf16.vlgmr.msra.gmra.mrb[20].mxu1 %vm232_vm11, %v570_v57 }
 0x535   :  { %1084 = vmatprep.mubr.msk.bf16.mxu1 %vm1161_vm10, %v1159_v14  ;;  %1077 = vmatpush3.bf16.msra.mxu1 %v1128_v39 }
 0x536   :  { %1078 = vmatprep.subr.bf16.mxu1 %v1159_v14 }
 0x539   :  { %1079 = vmatpush3.bf16.msra.mxu1 %v1129_v40 }
 0x53a   :  { %1080 = vmatprep.subr.bf16.mxu1 %v1159_v14 }
 0x53d   :  { %1081 = vmatpush3.bf16.msra.mxu1 %v1130_v41  ;;  %v857_v41 = vld [vmem:[%s1402_s4 + $0x7] ss:$0 sm:$0xff] }
 0x53e   :  { %1082 = vmatprep.subr.bf16.mxu1 %v1159_v14 }
 0x541   :  { %1083 = vmatpush3.bf16.msra.mxu1 %v1131_v42 }
 0x607   :  { %v625_v62 = vpop.f32.mrb[20].mxu1 }
 0x608   :  { %v626_v63 = vadd.f32 %v625_v62, %v575_v61  ;;  %v1066_v0 = vpop.f32.mrb[21].mxu1 }
 0x609   :  { %v628_v1 = vpop.f32.mrb[22].mxu1 }
 0x60a   :  { %v629_v2 = vadd.f32 %v628_v1, %v575_v61  ;;  %v1067_v3 = vpop.f32.mrb[23].mxu1  ;;  %v632_v4 = vadd.f32 %v626_v63, %v1256_v32 }
 0x60c   :  { %v634_v5 = vsel %vm232_vm11, %v632_v4, 0.0  ;;  %v633_v6 = vadd.f32 %v629_v2, %v1258_v34  ;;  %v1126_v34 = vld [vmem:[%s1401_s3 + $0x10] ss:$24 sps:$4 sm:$0xff]  }
 0x60d   :  { %635 = vadd.xlane.f32.xlu1 %v634_v5  ;;  %1069 = vmatpush3.bf16.msra.mxu0 %v1126_v34  ;;  %v756_v5 = vld [vmem:[%s1402_s4 + $0x3] ss:$0 sm:$0xff] }
 0x60e   :  { %v637_v7 = vsel %vm232_vm11, %v633_v6, 0.0  ;;  %1070 = vmatprep.subr.bf16.mxu0 %v1159_v14 }
 0x611   :  { %638 = vadd.xlane.f32.xlu1 %v637_v7  ;;  %1071 = vmatpush3.bf16.msra.mxu0 %v1127_v20 }
 0x612   :  { %1088 = vmatprep.subr.bf16.mxu0 %v1159_v14 }
 0x69a   :  { %v636_v8 = vpop.xlane.xlu1 %635 }
 0x69b   :  { %v641_v9 = vmul.f32 0.03125, %v636_v8 }
 0x69d   :  { %v643_v10 = vsub.f32 %v632_v4, %v641_v9 }
 0x69e   :  { %v639_v11 = vpop.xlane.xlu1 %638 }
 0x69f   :  { %v642_v12 = vmul.f32 0.03125, %v639_v11  ;;  %v645_v13 = vmul.f32 %v643_v10, %v643_v10 }
 0x6a1   :  { %v644_v15 = vsub.f32 %v633_v6, %v642_v12  ;;  %v647_v17 = vsel %vm232_vm11, %v645_v13, 0.0 }
 0x6a2   :  { %648 = vadd.xlane.f32.xlu1 %v647_v17 }
 0x6a3   :  { %v646_v19 = vmul.f32 %v644_v15, %v644_v15 }
 0x6a5   :  { %v650_v32 = vsel %vm232_vm11, %v646_v19, 0.0 }
 0x6a6   :  { %651 = vadd.xlane.f32.xlu1 %v650_v32 }
 0x72f   :  { %v649_v21 = vpop.xlane.xlu1 %648 }
 0x730   :  { %v653_v22 = vmul.f32 0.03125, %v649_v21 }
 0x732   :  { %v655_v23 = vadd.f32 1e-05, %v653_v22 }
 0x733   :  { %v652_v24 = vpop.xlane.xlu1 %651 }
 0x734   :  { %1142 = vrsqrt.f32 %v655_v23  ;;  %v654_v25 = vmul.f32 0.03125, %v652_v24 }
 0x736   :  { %v656_v16 = vadd.f32 1e-05, %v654_v25 }
 0x738   :  { %1144 = vrsqrt.f32 %v656_v16 }
 0x73e   :  { %v1143_v26 = vpop.eup %1142 }
 0x73f   :  { %v659_v27 = vmul.f32 %v1143_v26, %v643_v10  ;;  %v1132_v26 = vld [vmem:[%s1401_s3 + $0x14] ss:$24 sps:$4 sm:$0xff]  }
 0x741   :  { %v662_v30 = vmul.f32 %v661_v28, %v659_v27  ;;  %v1133_v27 = vld [vmem:[%s1401_s3 + $0x44] ss:$24 sps:$4 sm:$0xff]  }
 0x742   :  { %v1145_v29 = vpop.eup %1144 }
 0x743   :  { %v660_v31 = vmul.f32 %v1145_v29, %v644_v15  ;;  %v665_v36 = vadd.f32 %v664_v33, %v662_v30 }
 0x745   :  { %v663_v35 = vmul.f32 %v661_v28, %v660_v31 }
 0x747   :  { %v666_v37 = vadd.f32 %v664_v33, %v663_v35 }
 0x749   :  { %v667_v38 = vpack.c.bf16 %v666_v37, %v665_v36 }
 0x74b   :  { %1073 = vmatmul.mubr.msk.bf16.vlgmr.msra.gmra.mrb[8].mxu0 %vm232_vm11, %v667_v38  ;;  %v854_v38 = vld [vmem:[%s1402_s4 + $0x6] ss:$0 sm:$0xff] }
 0x74c   :  { %1092 = vmatprep.mubr.msk.bf16.mxu0 %vm1161_vm10, %v1159_v14  ;;  %1089 = vmatpush3.bf16.msra.mxu0 %v1132_v26 }
 0x74d   :  { %1090 = vmatprep.subr.bf16.mxu0 %v1159_v14 }
 0x750   :  { %1091 = vmatpush3.bf16.msra.mxu0 %v1133_v27 }
 0x81e   :  { %v722_v44 = vpop.f32.mrb[8].mxu0 }
 0x81f   :  { %v723_v45 = vadd.f32 %v722_v44, %v672_v43  ;;  %v1074_v46 = vpop.f32.mrb[9].mxu0 }
 0x820   :  { %v725_v47 = vpop.f32.mrb[10].mxu0 }
 0x821   :  { %v731_v48 = vmul.f32 0.044715, %v723_v45  ;;  %v726_v49 = vadd.f32 %v725_v47, %v672_v43  ;;  %v1075_v50 = vpop.f32.mrb[11].mxu0  ;;  %v729_v63 = vmul.f32 0.5, %v723_v45 }
 0x823   :  { %v733_v51 = vmul.f32 %v731_v48, %v723_v45  ;;  %v732_v52 = vmul.f32 0.044715, %v726_v49  ;;  %v730_v0 = vmul.f32 0.5, %v726_v49  ;;  %v865_v48 = vld [vmem:[%s1402_s4 + $0x18] ss:$0 sm:$0xff] }
 0x825   :  { %v735_v53 = vmul.f32 %v733_v51, %v723_v45  ;;  %v734_v54 = vmul.f32 %v732_v52, %v726_v49 }
 0x827   :  { %v737_v55 = vadd.f32 %v735_v53, %v723_v45  ;;  %v736_v56 = vmul.f32 %v734_v54, %v726_v49 }
 0x829   :  { %v739_v57 = vmul.f32 0.7978846, %v737_v55  ;;  %v738_v58 = vadd.f32 %v736_v56, %v726_v49 }
 0x82b   :  { %1146 = vtanh.f32 %v739_v57  ;;  %v740_v59 = vmul.f32 0.7978846, %v738_v58  ;;  %v944_v58 = vld [vmem:[%s1403_s1] sm:$0x3] }
 0x82d   :  { %1148 = vtanh.f32 %v740_v59  ;;  %v1163_v59 = vmov 127  }
 0x82e   :  { %1105 = vset.pattern.permute.xlu1 %v1163_v59  ;;  %1106 = vset.pattern.permute.xlu0 %v1163_v59 }
 0x835   :  { %v1147_v60 = vpop.eup %1146 }
 0x836   :  { %v743_v61 = vadd.f32 1.0, %v1147_v60  ;;  %v1096_v60 = vtrunc.f32 %v944_v58 }
 0x837   :  { %v1149_v62 = vpop.eup %1148 }
 0x838   :  { %v744_v1 = vadd.f32 1.0, %v1149_v62  ;;  %v745_v2 = vmul.f32 %v743_v61, %v729_v63  ;;  %v1097_v61 = vcvt.f32.s32 %v1096_v60 }
 0x83a   :  { %v746_v3 = vmul.f32 %v744_v1, %v730_v0 }
 0x83c   :  { %v747_v4 = vpack.c.bf16 %v746_v3, %v745_v2 }
 0x83e   :  { %1085 = vmatmul.mubr.msk.bf16.vlgmr.msra.gmra.mrb[24].mxu1 %vm781_vm14, %v747_v4 }
 0x911   :  { %v819_v6 = vpop.f32.mrb[24].mxu1 }
 0x912   :  { %v820_v7 = vadd.f32 %v819_v6, %v756_v5  ;;  %v1086_v8 = vpop.f32.mrb[25].mxu1 }
 0x913   :  { %v822_v9 = vpop.f32.mrb[26].mxu1 }
 0x914   :  { %v823_v10 = vadd.f32 %v822_v9, %v756_v5  ;;  %v1087_v11 = vpop.f32.mrb[27].mxu1  ;;  %v826_v12 = vadd.f32 %v820_v7, %v665_v36 }
 0x916   :  { %v828_v13 = vsel %vm232_vm11, %v826_v12, 0.0  ;;  %v827_v15 = vadd.f32 %v823_v10, %v666_v37 }
 0x917   :  { %829 = vadd.xlane.f32.xlu1 %v828_v13 }
 0x918   :  { %v831_v17 = vsel %vm232_vm11, %v827_v15, 0.0 }
 0x91b   :  { %832 = vadd.xlane.f32.xlu1 %v831_v17 }
 0x9a4   :  { %v830_v19 = vpop.xlane.xlu1 %829 }
 0x9a5   :  { %v834_v32 = vmul.f32 0.03125, %v830_v19 }
 0x9a7   :  { %v836_v34 = vsub.f32 %v826_v12, %v834_v32 }
 0x9a8   :  { %v833_v20 = vpop.xlane.xlu1 %832 }
 0x9a9   :  { %v835_v21 = vmul.f32 0.03125, %v833_v20  ;;  %v838_v22 = vmul.f32 %v836_v34, %v836_v34 }
 0x9ab   :  { %v837_v23 = vsub.f32 %v827_v15, %v835_v21  ;;  %v840_v24 = vsel %vm232_vm11, %v838_v22, 0.0 }
 0x9ac   :  { %841 = vadd.xlane.f32.xlu1 %v840_v24 }
 0x9ad   :  { %v839_v25 = vmul.f32 %v837_v23, %v837_v23 }
 0x9af   :  { %v843_v16 = vsel %vm232_vm11, %v839_v25, 0.0 }
 0x9b0   :  { %844 = vadd.xlane.f32.xlu0 %v843_v16 }
 0xa39   :  { %v842_v28 = vpop.xlane.xlu1 %841 }
 0xa3a   :  { %v846_v29 = vmul.f32 0.03125, %v842_v28 }
 0xa3c   :  { %v848_v30 = vadd.f32 1e-05, %v846_v29 }
 0xa3d   :  { %v845_v31 = vpop.xlane.xlu0 %844 }
 0xa3e   :  { %1150 = vrsqrt.f32 %v848_v30  ;;  %v847_v33 = vmul.f32 0.03125, %v845_v31 }
 0xa40   :  { %v849_v35 = vadd.f32 1e-05, %v847_v33 }
 0xa42   :  { %1152 = vrsqrt.f32 %v849_v35 }
 0xa48   :  { %v1151_v36 = vpop.eup %1150 }
 0xa49   :  { %v852_v37 = vmul.f32 %v1151_v36, %v836_v34 }
 0xa4b   :  { %v855_v39 = vmul.f32 %v854_v38, %v852_v37 }
 0xa4c   :  { %v1153_v14 = vpop.eup %1152 }
 0xa4d   :  { %v853_v40 = vmul.f32 %v1153_v14, %v837_v23  ;;  %v858_v43 = vadd.f32 %v857_v41, %v855_v39 }
 0xa4f   :  { %v856_v42 = vmul.f32 %v854_v38, %v853_v40 }
 0xa51   :  { %v859_v44 = vadd.f32 %v857_v41, %v856_v42 }
 0xa53   :  { %v860_v45 = vpack.c.bf16 %v859_v44, %v858_v43 }
 0xa55   :  { %1093 = vmatmul.mubr.msk.bf16.vlgmr.msra.gmra.mrb[12].mxu0 %vm232_vm11, %v860_v45 }
 0xb28   :  { %v915_v46 = vpop.f32.mrb[12].mxu0 }
 0xb29   :  { %v1094_v47 = vpop.f32.mrb[13].mxu0  ;;  %v916_v52 = vadd.f32 %v915_v46, %v865_v48 }
 0xb2a   :  { %v918_v49 = vpop.f32.mrb[14].mxu0 }
 0xb2b   :  { %v919_v50 = vadd.f32 %v918_v49, %v865_v48  ;;  %v1095_v51 = vpop.f32.mrb[15].mxu0 }
 0xb2d   :  { %v925_v53 = vrot.slane %v919_v50, 7 }
 0xb2f   :  { %v927_v54 = vsel %vm926_vm15, %v925_v53, %v916_v52 }
 0xb30   :  { %v929_v55 = vsel %vm922_vm0, %v927_v54, -1e+30  ;;  %v955_v56 = vsel %vm922_vm0, %v927_v54, 0.0 }
 0xb31   :  { %v931_v57 = vsel %vm930_vm1, %v929_v55, -inf }
 0xb32   :  { %932 = vmax.xlane.f32.xlu1 %v931_v57 }
 0xb43   :  { %947 = vperm.xlu1 %1105, %v1097_v61  }
 0xbbf   :  { %v933_v62 = vpop.xlane.xlu1 %932 }
 0xbc0   :  { %v934_v63 = vsub.f32 %v929_v55, %v933_v62 }
 0xbc2   :  { %v935_v0 = vmul.f32 1.442695, %v934_v63 }
 0xbc3   :  { %v948_v6 = vpop.permute.xlu1 %947 }
 0xbc4   :  { %1154 = vpow2.f32 %v935_v0  ;;  %vm949_vm2 = vcmp.eq.s32.totalorder %v1237_v18, %v948_v6 }
 0xbce   :  { %v1155_v1 = vpop.eup %1154 }
 0xbcf   :  { %v937_v2 = vsel %vm930_vm1, %v1155_v1, 0.0 }
 0xbd0   :  { %938 = vadd.xlane.f32.xlu0 %v937_v2 }
 0xc5d   :  { %v939_v3 = vpop.xlane.xlu0 %938 }
 0xc5e   :  { %1156 = vlog2.f32 %v939_v3 }
 0xc68   :  { %v1157_v4 = vpop.eup %1156 }
 0xc69   :  { %v941_v5 = vmul.f32 0.6931472, %v1157_v4 }
 0xc6b   :  { %v942_v7 = vadd.f32 %v941_v5, %v933_v62 }
 0xc6d   :  { %v943_v8 = vsub.f32 %v929_v55, %v942_v7 }
 0xc6f   :  { %v950_v9 = vsel %vm949_vm2, %v943_v8, 0.0 }
 0xc70   :  { %v951_v10 = vsel %vm930_vm1, %v950_v9, 0.0 }
 0xc71   :  { %952 = vadd.xlane.f32.xlu0 %v951_v10 }
 0xcfe   :  { %v953_v11 = vpop.xlane.xlu0 %952 }
 0xcff   :  { %v954_v12 = vsub.f32 0.0, %v953_v11 }
 0xd01   :  { %v957_v13 = vsel %vm956_vm3, %v954_v12, 0.0 }
 0xd02   :  { %v958_v15 = vadd.f32 %v957_v13, %v955_v56 }
 0xd04   :  { %959 = vst [vmem:[%s1404_s5] sm:$0x3] %v958_v15 }

</bundles_post_ra>
